<compile_context>
chip_gen: v5e
topology: v5e:2x2
jax: 0.10.0
libtpu: 0.0.40
codegen_flags: <defaults>
</compile_context>

<pallas_src>
import functools

import jax
import jax.numpy as jnp
from jax.experimental import pallas as pl
from jax.experimental.pallas import tpu as pltpu


_VMEM_TILE_BUDGET = 24 << 20   # double-buffered tile footprint budget (all gens)
_VMEM_LIMIT_CAP = 48 << 20     # explicit scoped-VMEM limit, safe on v7x (64 MiB phys)


def _round_up(x: int, m: int) -> int:
    return ((x + m - 1) // m) * m


def _pick_tile(dim: int, target: int, align: int) -> int:
    """Largest tile (multiple of `align`, <= target) dividing round_up(dim, align).

    Keeps padding overshoot < `align`, instead of blowing the dim up to the
    next multiple of a too-large tile (e.g. C=600 with tn=512 -> 1024)."""
    dp = _round_up(dim, align)
    if dp <= target:
        return dp
    best = align
    t = align
    while t <= target:
        if dp % t == 0:
            best = t
        t += align
    return best


def _linear_kernel(x_ref, w_ref, b_ref, o_ref, acc_ref):
    # x_ref:   (tm, tk)  activation tile
    # w_ref:   (tk, tn)  weight tile, already transposed to (D, C) K-major layout
    # b_ref:   (1, tn)   f32 bias tile
    # o_ref:   (tm, tn)  output tile (resident across the K grid axis)
    # acc_ref: (tm, tn)  f32 accumulator scratch
    k = pl.program_id(2)

    @pl.when(k == 0)
    def _():
        # Seed the accumulator with the bias -> no separate finalize add pass.
        acc_ref[...] = jnp.broadcast_to(b_ref[...], acc_ref.shape)

    # (tm, tk) @ (tk, tn) on the MXU, f32 accumulation. HIGHEST precision is a
    # no-op for bf16 inputs and preserves full f32 accuracy for f32 inputs.
    acc_ref[...] += jnp.dot(
        x_ref[...],
        w_ref[...],
        preferred_element_type=jnp.float32,
        precision=jax.lax.Precision.HIGHEST,
    )

    @pl.when(k == pl.num_programs(2) - 1)
    def _():
        o_ref[...] = acc_ref[...].astype(o_ref.dtype)


def prepare_params(weight, bias, *, tn_target=1024, tk_target=1024,
                   compute_dtype=None):
    """One-time (outside the hot path) weight/bias preparation.

    weight: (C, D) in PyTorch nn.Linear layout, bias: (C,).
    Returns (w_t, b_p, cfg):
      w_t: (Dp, Cp) K-major, zero-padded, optionally downcast (e.g. bf16)
      b_p: (1, Cp)  f32, zero-padded
      cfg: static tiling info to pass to classification_head_forward.
    """
    C, D = weight.shape
    tn = _pick_tile(C, tn_target, 128)
    tk = _pick_tile(D, tk_target, 128)
    Cp = _round_up(C, tn)
    Dp = _round_up(D, tk)
    w_dtype = compute_dtype if compute_dtype is not None else weight.dtype
    w_t = jnp.pad(weight.astype(w_dtype).T, ((0, Dp - D), (0, Cp - C)))
    b_p = jnp.pad(bias.astype(jnp.float32), (0, Cp - C)).reshape(1, Cp)
    cfg = dict(num_classes=C, input_dim=D, tn=tn, tk=tk)
    return w_t, b_p, cfg


@functools.partial(
    jax.jit, static_argnames=("num_classes", "input_dim", "tn", "tk", "tm_target"))
def classification_head_forward(x, w_t, b_p, *, num_classes, input_dim, tn, tk,
                                tm_target=None):
    """y = x @ W.T + b with pre-prepared (transposed / padded) parameters."""
    B, D = x.shape
    assert D == input_dim, "input_dim mismatch"
    Dp, Cp = w_t.shape
    out_dtype = x.dtype

    x_c = x.astype(w_t.dtype)
    in_bytes = jnp.dtype(w_t.dtype).itemsize
    out_bytes = jnp.dtype(out_dtype).itemsize

    # Grow tm toward the whole padded batch (so W streams from HBM once),
    # bounded by the double-buffered VMEM tile footprint:
    #   2*(tm*tk) x + 2*(tk*tn) W + 2*(tm*tn) out + (tm*tn) f32 acc + bias.
    fixed = 2 * tk * tn * in_bytes + 2 * tn * 4
    per_tm = 2 * tk * in_bytes + 2 * tn * out_bytes + tn * 4
    tm_cap = max(8, ((_VMEM_TILE_BUDGET - fixed) // per_tm) // 8 * 8)
    if tm_target is not None:
        tm_cap = min(tm_cap, max(8, _round_up(tm_target, 8)))
    Bp8 = _round_up(B, 8)
    tm = Bp8 if Bp8 <= tm_cap else _pick_tile(B, tm_cap, 8)
    Bp = _round_up(B, tm)

    # Only the (small) activation tensor is padded per call.
    x_p = jnp.pad(x_c, ((0, Bp - B), (0, Dp - D)))

    grid = (Bp // tm, Cp // tn, Dp // tk)

    footprint = (2 * tm * tk * in_bytes + 2 * tk * tn * in_bytes
                 + 2 * tm * tn * out_bytes + tm * tn * 4 + 2 * tn * 4)
    vmem_limit = int(min(max(footprint * 5 // 4 + (2 << 20), 16 << 20),
                         _VMEM_LIMIT_CAP))

    cost = pl.CostEstimate(
        flops=2 * B * D * num_classes,
        transcendentals=0,
        bytes_accessed=(in_bytes * Bp * Dp * grid[1]      # x re-read per N tile
                        + in_bytes * Dp * Cp * grid[0]    # W re-read per M tile
                        + out_bytes * Bp * Cp
                        + 4 * Cp),
    )

    out_p = pl.pallas_call(
        _linear_kernel,
        out_shape=jax.ShapeDtypeStruct((Bp, Cp), out_dtype),
        grid=grid,
        in_specs=[
            pl.BlockSpec((tm, tk), lambda i, j, k: (i, k)),   # x tile
            pl.BlockSpec((tk, tn), lambda i, j, k: (k, j)),   # W tile, K-major (D, C)
            pl.BlockSpec((1, tn), lambda i, j, k: (0, j)),    # bias tile
        ],
        out_specs=pl.BlockSpec((tm, tn), lambda i, j, k: (i, j)),
        scratch_shapes=[pltpu.VMEM((tm, tn), jnp.float32)],
        compiler_params=pltpu.CompilerParams(
            dimension_semantics=("parallel", "parallel", "arbitrary"),
            vmem_limit_bytes=vmem_limit,
        ),
        cost_estimate=cost,
    )(x_p, w_t, b_p)

    return out_p[:B, :num_classes]


def classification_head(x, weight, bias, *, compute_dtype=None, use_pallas=None):
    """Convenience wrapper: nn.Linear forward with a small-problem fast path.

    For tiny heads the ~0.35 us/grid-step overhead plus pad/slice dominates and
    a fused XLA dot wins; for production use, call prepare_params() once and
    classification_head_forward() per step instead (hoists W transpose/pad)."""
    B, D = x.shape
    C = weight.shape[0]
    if use_pallas is None:
        use_pallas = (B * D * C) >= (1 << 21)
    if not use_pallas:
        return (x @ weight.T + bias).astype(x.dtype)
    w_t, b_p, cfg = prepare_params(weight, bias, compute_dtype=compute_dtype)
    return classification_head_forward(x, w_t, b_p, **cfg)


def init_params(key, input_dim, num_classes):
    """Deterministic init mimicking nn.Linear's uniform(-k, k), k = 1/sqrt(input_dim)."""
    kw, kb = jax.random.split(key)
    k = 1.0 / jnp.sqrt(jnp.asarray(input_dim, jnp.float32))
    weight = jax.random.uniform(kw, (num_classes, input_dim), jnp.float32, -k, k)
    bias = jax.random.uniform(kb, (num_classes,), jnp.float32, -k, k)
    return weight, bias


if __name__ == "__main__":
    key = jax.random.PRNGKey(0)
    kx, kp = jax.random.split(key)

    batch = 4
    input_dim = 32
    num_classes = 10

    x = jax.random.normal(kx, (batch, input_dim), jnp.float32)
    weight, bias = init_params(kp, input_dim, num_classes)

    # One-time parameter prep (transpose to (D, C), pad) hoisted out of the
    # per-step path, then run the Pallas kernel directly to exercise it.
    w_t, b_p, cfg = prepare_params(weight, bias)
    y = classification_head_forward(x, w_t, b_p, **cfg)
    y = jax.block_until_ready(y)

    # Reference check (same math as torch nn.Linear), matched precision.
    y_ref = jnp.dot(x, weight.T, precision=jax.lax.Precision.HIGHEST) + bias
    assert y.shape == (batch, num_classes)
    assert jnp.allclose(y, y_ref, atol=2e-5, rtol=1e-5), "mismatch vs reference"

    print("KERNEL_OK")
</pallas_src>

<mosaic_0001>
module attributes {stable_mosaic.version = 11 : i64} {
  func.func @_linear_kernel(%arg0: i32, %arg1: i32, %arg2: i32, %arg3: memref<8x128xf32, #tpu.memory_space<vmem>>, %arg4: memref<128x128xf32, #tpu.memory_space<vmem>>, %arg5: memref<1x128xf32, #tpu.memory_space<vmem>>, %arg6: memref<8x128xf32, #tpu.memory_space<vmem>>, %arg7: memref<8x128xf32, #tpu.memory_space<vmem>>) attributes {dimension_semantics = [#tpu.dimension_semantics<parallel>, #tpu.dimension_semantics<parallel>, #tpu.dimension_semantics<arbitrary>], iteration_bounds = array<i64: 1, 1, 1>, scalar_prefetch = 0 : i64, scratch_operands = 1 : i64, tpu.core_type = #tpu.core_type<tc>, window_params = [{transform_indices = @transform_0, window_bounds = array<i64: 8, 128>}, {transform_indices = @transform_1, window_bounds = array<i64: 128, 128>}, {transform_indices = @transform_2, window_bounds = array<i64: 1, 128>}, {transform_indices = @transform_3, window_bounds = array<i64: 8, 128>}]} {
    %c0_i32 = arith.constant 0 : i32
    %0 = arith.cmpi eq, %arg2, %c0_i32 : i32
    %1 = arith.extui %0 : i1 to i32
    %c0_i32_0 = arith.constant 0 : i32
    %2 = arith.cmpi ne, %1, %c0_i32_0 : i32
    scf.if %2 {
      %c0_10 = arith.constant 0 : index
      %c0_11 = arith.constant 0 : index
      %12 = vector.load %arg5[%c0_10, %c0_11] : memref<1x128xf32, #tpu.memory_space<vmem>>, vector<1x128xf32>
      %13 = vector.shape_cast %12 : vector<1x128xf32> to vector<1x128xf32>
      %14 = vector.broadcast %13 : vector<1x128xf32> to vector<8x128xf32>
      %c0_12 = arith.constant 0 : index
      %c0_13 = arith.constant 0 : index
      %15 = vector.load %arg7[%c0_12, %c0_13] : memref<8x128xf32, #tpu.memory_space<vmem>>, vector<8x128xf32>
      tpu.vector_store %arg7[%c0_12, %c0_13], %14 {strides = array<i32>} : memref<8x128xf32, #tpu.memory_space<vmem>>, vector<8x128xf32>,
    } else {
    }
    %c0 = arith.constant 0 : index
    %c0_1 = arith.constant 0 : index
    %3 = vector.load %arg7[%c0, %c0_1] : memref<8x128xf32, #tpu.memory_space<vmem>>, vector<8x128xf32>
    %c0_2 = arith.constant 0 : index
    %c0_3 = arith.constant 0 : index
    %4 = vector.load %arg3[%c0_2, %c0_3] : memref<8x128xf32, #tpu.memory_space<vmem>>, vector<8x128xf32>
    %c0_4 = arith.constant 0 : index
    %c0_5 = arith.constant 0 : index
    %5 = vector.load %arg4[%c0_4, %c0_5] : memref<128x128xf32, #tpu.memory_space<vmem>>, vector<128x128xf32>
    %cst = arith.constant dense<0.000000e+00> : vector<8x128xf32>
    %6 = tpu.matmul %4, %5, %cst {dimension_numbers = #tpu.dot_dimension_numbers<[1], [0], [0], [1], [0, 0, 1, 1], [], []>, precision = #tpu.contract_precision<fp32>} : vector<8x128xf32>, vector<128x128xf32>, vector<8x128xf32> -> vector<8x128xf32>
    %7 = arith.addf %3, %6 : vector<8x128xf32>
    %c0_6 = arith.constant 0 : index
    %c0_7 = arith.constant 0 : index
    %8 = vector.load %arg7[%c0_6, %c0_7] : memref<8x128xf32, #tpu.memory_space<vmem>>, vector<8x128xf32>
    tpu.vector_store %arg7[%c0_6, %c0_7], %7 {strides = array<i32>} : memref<8x128xf32, #tpu.memory_space<vmem>>, vector<8x128xf32>,
    %c0_i32_8 = arith.constant 0 : i32
    %9 = arith.cmpi eq, %arg2, %c0_i32_8 : i32
    %10 = arith.extui %9 : i1 to i32
    %c0_i32_9 = arith.constant 0 : i32
    %11 = arith.cmpi ne, %10, %c0_i32_9 : i32
    scf.if %11 {
      %c0_10 = arith.constant 0 : index
      %c0_11 = arith.constant 0 : index
      %12 = vector.load %arg7[%c0_10, %c0_11] : memref<8x128xf32, #tpu.memory_space<vmem>>, vector<8x128xf32>
      %c0_12 = arith.constant 0 : index
      %c0_13 = arith.constant 0 : index
      %13 = vector.load %arg6[%c0_12, %c0_13] : memref<8x128xf32, #tpu.memory_space<vmem>>, vector<8x128xf32>
      tpu.vector_store %arg6[%c0_12, %c0_13], %12 {strides = array<i32>} : memref<8x128xf32, #tpu.memory_space<vmem>>, vector<8x128xf32>,
    } else {
    }
    return
  }
  func.func @transform_0(%arg0: i32, %arg1: i32, %arg2: i32) -> (i32, i32) {
    %c0_i32 = arith.constant 0 : i32
    return %arg0, %arg2 : i32, i32
  }
  func.func @transform_1(%arg0: i32, %arg1: i32, %arg2: i32) -> (i32, i32) {
    %c0_i32 = arith.constant 0 : i32
    return %arg2, %arg1 : i32, i32
  }
  func.func @transform_2(%arg0: i32, %arg1: i32, %arg2: i32) -> (i32, i32) {
    %c0_i32 = arith.constant 0 : i32
    %c0_i32_0 = arith.constant 0 : i32
    return %c0_i32, %arg1 : i32, i32
  }
  func.func @transform_3(%arg0: i32, %arg1: i32, %arg2: i32) -> (i32, i32) {
    %c0_i32 = arith.constant 0 : i32
    return %arg0, %arg1 : i32, i32
  }
}

</mosaic_0001>

<bundles_post_ra>
// kernel: classification_head_forward.1
= control target key start
LH: loop header
LB: loop body
LE: loop exit
PB: predicated region body
PF: predicated region fallthrough
CT: control target
= control target key end

     0   :  { %8 = vsyncpa [#allocation4], 0  ;;  %s440_s15 = smov [#allocation3]   ;;  %s441_s17 = smov 128   ;;  %s713_s0 = inlined_call_operand.vmem [shape: f32[8,128], index: 0, kind: input, shape index: {}]   ;;  %s714_s1 = inlined_call_operand.hbm [shape: f32[128,128], index: 1, kind: input, shape index: {}]   ;;  %s715_s2 = inlined_call_operand.vmem [shape: f32[1,128], index: 2, kind: input, shape index: {}]   ;;  %s716_s3 = inlined_call_operand.vmem [shape: f32[8,128], index: 3, kind: output, shape index: {}]  }
   0x1   :  { %s15_s14 = sshll.u32 %s714_s1, 4  ;;  %s17_s16 = sshll.u32 %s440_s15, 4  ;;  %s16_s14 = int_to_ptr.hbm [resolvable:$true] %s15_s14  ;;  %s18_s16 = int_to_ptr.vmem [resolvable:$true] %s17_s16 }
   0x2   :  { %s442_s18 = smov 8  }
   0x3   :  { %23 = dma.hbm_to_vmem [thread:$0]  %s16_s14, 2048, %s18_s16, [#allocation4], %s441_s17, %s441_s17, %s442_s18  }
   0x4   :  { %438 = dma.done.wait [#allocation4], 2048  }
   0x5   :  { %439 = vsyncadd [#allocation4], 4294965248  ;;  %v56_v0 = vld [vmem:[#allocation3 + $0x78] sm:$0xff]  ;;  %v55_v1 = vld [vmem:[#allocation3 + $0x70] sm:$0xff] }
   0x6   :  { %v54_v2 = vld [vmem:[#allocation3 + $0x68] sm:$0xff]  ;;  %v466_v3 = vand.u32 4294901760, %v56_v0  ;;  %v468_v4 = vand.u32 4294901760, %v55_v1  ;;  %v53_v6 = vld [vmem:[#allocation3 + $0x60] sm:$0xff]  ;;  %v52_v7 = vld [vmem:[#allocation3 + $0x58] sm:$0xff] }
   0x7   :  { %v470_v5 = vand.u32 4294901760, %v54_v2  ;;  %v51_v8 = vld [vmem:[#allocation3 + $0x50] sm:$0xff]  ;;  %v472_v9 = vand.u32 4294901760, %v53_v6  ;;  %v474_v10 = vand.u32 4294901760, %v52_v7  ;;  %v50_v12 = vld [vmem:[#allocation3 + $0x48] sm:$0xff]  ;;  %v49_v13 = vld [vmem:[#allocation3 + $0x40] sm:$0xff] }
   0x8   :  { %v476_v11 = vand.u32 4294901760, %v51_v8  ;;  %58 = vmatpush.msra.mxu0 %v466_v3  ;;  %v480_v14 = vsub.f32 %v56_v0, %v466_v3  ;;  %v483_v15 = vsub.f32 %v55_v1, %v468_v4  ;;  %v488_v17 = vand.u32 4294901760, %v50_v12  ;;  %v48_v18 = vld [vmem:[#allocation3 + $0x38] sm:$0xff]  ;;  %254 = vmatpush.msra.mxu3 %v466_v3  ;;  %v47_v26 = vld [vmem:[#allocation3 + $0x30] sm:$0xff]  ;;  %v46_v36 = vld [vmem:[#allocation3 + $0x28] sm:$0xff] }
   0x9   :  { %v486_v16 = vsub.f32 %v54_v2, %v470_v5  ;;  %v492_v19 = vsub.f32 %v53_v6, %v472_v9  ;;  %v495_v20 = vsub.f32 %v52_v7, %v474_v10  ;;  %v504_v25 = vand.u32 4294901760, %v49_v13  ;;  %v45_v42 = vld [vmem:[#allocation3 + $0x20] sm:$0xff]  ;;  %v44_v47 = vld [vmem:[#allocation3 + $0x18] sm:$0xff]  ;;  %v43_v55 = vld [vmem:[#allocation3 + $0x10] sm:$0xff] }
   0xa   :  { %v498_v21 = vsub.f32 %v51_v8, %v476_v11  ;;  %60 = vmatpush.msra.mxu0 %v468_v4  ;;  %v100_v22 = vand.u32 4294901760, %v480_v14  ;;  %v106_v23 = vand.u32 4294901760, %v483_v15  ;;  %201 = vmatpush.msra.mxu2 %v480_v14  ;;  %v508_v28 = vand.u32 4294901760, %v48_v18  ;;  %v42_v60 = vld [vmem:[#allocation3 + $0x8] sm:$0xff]  ;;  %v41_v1 = vld [vmem:[#allocation3] sm:$0xff] }
   0xb   :  { %v112_v24 = vand.u32 4294901760, %v486_v16  ;;  %v118_v27 = vand.u32 4294901760, %v492_v19  ;;  %v511_v29 = vsub.f32 %v50_v12, %v488_v17  ;;  %256 = vmatpush.msra.mxu3 %v468_v4  ;;  %v124_v33 = vand.u32 4294901760, %v495_v20  ;;  %v40_v7 = vld [vmem:[%s713_s0] sm:$0xff] }
   0xc   :  { %62 = vmatpush.msra.mxu0 %v470_v5  ;;  %v101_v30 = vsub.f32 %v480_v14, %v100_v22  ;;  %v107_v31 = vsub.f32 %v483_v15, %v106_v23  ;;  %204 = vmatpush.msra.mxu2 %v483_v15  ;;  %v130_v34 = vand.u32 4294901760, %v498_v21  ;;  %v527_v35 = vand.u32 4294901760, %v47_v26 }
   0xd   :  { %v113_v32 = vsub.f32 %v486_v16, %v112_v24  ;;  %258 = vmatpush.msra.mxu3 %v470_v5  ;;  %v119_v39 = vsub.f32 %v492_v19, %v118_v27  ;;  %v535_v40 = vsub.f32 %v49_v13, %v504_v25  ;;  %v136_v41 = vand.u32 4294901760, %v511_v29 }
   0xe   :  { %v102_v37 = vand.u32 4294901760, %v101_v30  ;;  %64 = vmatpush.msra.mxu0 %v472_v9  ;;  %v108_v38 = vand.u32 4294901760, %v107_v31  ;;  %207 = vmatpush.msra.mxu2 %v486_v16  ;;  %v125_v44 = vsub.f32 %v495_v20, %v124_v33  ;;  %v544_v45 = vand.u32 4294901760, %v46_v36 }
   0xf   :  { %260 = vmatpush.msra.mxu3 %v472_v9  ;;  %v114_v43 = vand.u32 4294901760, %v113_v32  ;;  %v547_v46 = vsub.f32 %v48_v18, %v508_v28  ;;  %v131_v48 = vsub.f32 %v498_v21, %v130_v34  ;;  %v120_v49 = vand.u32 4294901760, %v119_v39 }
  0x10   :  { %103 = vmatpush.msra.mxu1 %v102_v37  ;;  %66 = vmatpush.msra.mxu0 %v474_v10  ;;  %v142_v50 = vand.u32 4294901760, %v535_v40  ;;  %v556_v51 = vand.u32 4294901760, %v45_v42  ;;  %v559_v52 = vsub.f32 %v47_v26, %v527_v35  ;;  %v137_v53 = vsub.f32 %v511_v29, %v136_v41 }
  0x11   :  { %210 = vmatpush.msra.mxu2 %v492_v19  ;;  %262 = vmatpush.msra.mxu3 %v474_v10  ;;  %v564_v54 = vand.u32 4294901760, %v44_v47  ;;  %v126_v56 = vand.u32 4294901760, %v125_v44  ;;  %v148_v57 = vand.u32 4294901760, %v547_v46  ;;  %v571_v58 = vsub.f32 %v46_v36, %v544_v45 }
  0x12   :  { %109 = vmatpush.msra.mxu1 %v108_v38  ;;  %68 = vmatpush.msra.mxu0 %v476_v11  ;;  %v132_v59 = vand.u32 4294901760, %v131_v48  ;;  %v143_v61 = vsub.f32 %v535_v40, %v142_v50  ;;  %v154_v62 = vand.u32 4294901760, %v559_v52  ;;  %v580_v63 = vand.u32 4294901760, %v43_v55 }
  0x13   :  { %213 = vmatpush.msra.mxu2 %v495_v20  ;;  %264 = vmatpush.msra.mxu3 %v476_v11  ;;  %v583_v0 = vsub.f32 %v45_v42, %v556_v51  ;;  %v138_v2 = vand.u32 4294901760, %v137_v53  ;;  %v586_v6 = vsub.f32 %v44_v47, %v564_v54  ;;  %v149_v8 = vsub.f32 %v547_v46, %v148_v57 }
  0x14   :  { %115 = vmatpush.msra.mxu1 %v114_v43  ;;  %70 = vmatpush.msra.mxu0 %v488_v17  ;;  %v160_v12 = vand.u32 4294901760, %v571_v58  ;;  %v598_v13 = vand.u32 4294901760, %v42_v60  ;;  %v600_v18 = vand.u32 4294901760, %v40_v7  ;;  %v602_v26 = vand.u32 4294901760, %v41_v1 }
  0x15   :  { %216 = vmatpush.msra.mxu2 %v498_v21  ;;  %266 = vmatpush.msra.mxu3 %v488_v17  ;;  %v144_v30 = vand.u32 4294901760, %v143_v61  ;;  %v155_v31 = vsub.f32 %v559_v52, %v154_v62  ;;  %v166_v32 = vand.u32 4294901760, %v583_v0  ;;  %v612_v36 = vsub.f32 %v43_v55, %v580_v63 }
  0x16   :  { %121 = vmatpush.msra.mxu1 %v120_v49  ;;  %72 = vmatpush.msra.mxu0 %v504_v25  ;;  %v172_v37 = vand.u32 4294901760, %v586_v6  ;;  %v150_v38 = vand.u32 4294901760, %v149_v8  ;;  %v161_v39 = vsub.f32 %v571_v58, %v160_v12  ;;  %v622_v42 = vsub.f32 %v42_v60, %v598_v13 }
  0x17   :  { %219 = vmatpush.msra.mxu2 %v511_v29  ;;  %268 = vmatpush.msra.mxu3 %v504_v25  ;;  %v90_v43 = vsub.f32 %v40_v7, %v600_v18  ;;  %v156_v44 = vand.u32 4294901760, %v155_v31  ;;  %v167_v47 = vsub.f32 %v583_v0, %v166_v32  ;;  %v178_v48 = vand.u32 4294901760, %v612_v36 }
  0x18   :  { %127 = vmatpush.msra.mxu1 %v126_v56  ;;  %74 = vmatpush.msra.mxu0 %v508_v28  ;;  %v633_v49 = vsub.f32 %v41_v1, %v602_v26  ;;  %v162_v53 = vand.u32 4294901760, %v161_v39  ;;  %v173_v55 = vsub.f32 %v586_v6, %v172_v37  ;;  %v184_v56 = vand.u32 4294901760, %v622_v42 }
  0x19   :  { %222 = vmatpush.msra.mxu2 %v535_v40  ;;  %270 = vmatpush.msra.mxu3 %v508_v28  ;;  %v168_v60 = vand.u32 4294901760, %v167_v47  ;;  %v179_v61 = vsub.f32 %v612_v36, %v178_v48 }
  0x1a   :  { %133 = vmatpush.msra.mxu1 %v132_v59  ;;  %76 = vmatpush.msra.mxu0 %v527_v35  ;;  %v91_v59 = vand.u32 4294901760, %v90_v43  ;;  %v190_v1 = vand.u32 4294901760, %v633_v49  ;;  %v185_v7 = vsub.f32 %v622_v42, %v184_v56 }
  0x1b   :  { %225 = vmatpush.msra.mxu2 %v547_v46  ;;  %272 = vmatpush.msra.mxu3 %v527_v35 }
  0x1c   :  { %139 = vmatpush.msra.mxu1 %v138_v2  ;;  %78 = vmatpush.msra.mxu0 %v544_v45  ;;  %v174_v2 = vand.u32 4294901760, %v173_v55  ;;  %v92_v8 = vsub.f32 %v90_v43, %v91_v59  ;;  %v191_v31 = vsub.f32 %v633_v49, %v190_v1 }
  0x1d   :  { %228 = vmatpush.msra.mxu2 %v559_v52  ;;  %274 = vmatpush.msra.mxu3 %v544_v45 }
  0x1e   :  { %145 = vmatpush.msra.mxu1 %v144_v30  ;;  %80 = vmatpush.msra.mxu0 %v556_v51  ;;  %v180_v30 = vand.u32 4294901760, %v179_v61  ;;  %v93_v39 = vand.u32 4294901760, %v92_v8 }
  0x1f   :  { %231 = vmatpush.msra.mxu2 %v571_v58  ;;  %276 = vmatpush.msra.mxu3 %v556_v51 }
  0x20   :  { %151 = vmatpush.msra.mxu1 %v150_v38  ;;  %82 = vmatpush.msra.mxu0 %v564_v54  ;;  %v186_v38 = vand.u32 4294901760, %v185_v7 }
  0x21   :  { %234 = vmatpush.msra.mxu2 %v583_v0  ;;  %278 = vmatpush.msra.mxu3 %v564_v54 }
  0x22   :  { %157 = vmatpush.msra.mxu1 %v156_v44  ;;  %84 = vmatpush.msra.mxu0 %v580_v63  ;;  %v192_v44 = vand.u32 4294901760, %v191_v31 }
  0x23   :  { %237 = vmatpush.msra.mxu2 %v586_v6  ;;  %280 = vmatpush.msra.mxu3 %v580_v63 }
  0x24   :  { %163 = vmatpush.msra.mxu1 %v162_v53  ;;  %86 = vmatpush.msra.mxu0 %v598_v13 }
  0x25   :  { %240 = vmatpush.msra.mxu2 %v612_v36  ;;  %282 = vmatpush.msra.mxu3 %v598_v13 }
  0x26   :  { %169 = vmatpush.msra.mxu1 %v168_v60  ;;  %88 = vmatpush.msra.mxu0 %v602_v26 }
  0x27   :  { %243 = vmatpush.msra.mxu2 %v622_v42  ;;  %284 = vmatpush.msra.mxu3 %v602_v26 }
  0x28   :  { %295 = vmatpush.msrb.mxu0 %v100_v22  ;;  %175 = vmatpush.msra.mxu1 %v174_v2 }
  0x29   :  { %246 = vmatpush.msra.mxu2 %v633_v49  ;;  %288 = vmatmul.f32.vlgmr.msra.gmra.mxu3 %v91_v59 }
  0x2a   :  { %299 = vmatpush.msrb.mxu0 %v106_v23  ;;  %181 = vmatpush.msra.mxu1 %v180_v30 }
  0x2b   :  { %249 = vmatmul.f32.vlgmr.msra.gmra.mxu2 %v90_v43  ;;  %94 = vmatmul.f32.vlgmr.msra.gmra.mxu0 %v93_v39 }
  0x2c   :  { %303 = vmatpush.msrb.mxu0 %v112_v24  ;;  %187 = vmatpush.msra.mxu1 %v186_v38 }
  0x2e   :  { %307 = vmatpush.msrb.mxu0 %v118_v27  ;;  %193 = vmatpush.msra.mxu1 %v192_v44 }
  0x2f   :  { %195 = vmatmul.f32.vlgmr.msra.gmra.mxu1 %v600_v18 }
  0x30   :  { %362 = vmatpush.msrb.mxu1 %v466_v3  ;;  %311 = vmatpush.msrb.mxu0 %v124_v33 }
  0x32   :  { %364 = vmatpush.msrb.mxu1 %v468_v4  ;;  %315 = vmatpush.msrb.mxu0 %v130_v34 }
  0x34   :  { %366 = vmatpush.msrb.mxu1 %v470_v5  ;;  %319 = vmatpush.msrb.mxu0 %v136_v41 }
  0x36   :  { %368 = vmatpush.msrb.mxu1 %v472_v9  ;;  %323 = vmatpush.msrb.mxu0 %v142_v50 }
  0x38   :  { %370 = vmatpush.msrb.mxu1 %v474_v10  ;;  %327 = vmatpush.msrb.mxu0 %v148_v57 }
  0x3a   :  { %372 = vmatpush.msrb.mxu1 %v476_v11  ;;  %331 = vmatpush.msrb.mxu0 %v154_v62 }
  0x3c   :  { %374 = vmatpush.msrb.mxu1 %v488_v17  ;;  %335 = vmatpush.msrb.mxu0 %v160_v12  ;;  %v413_v17 = vld [vmem:[%s715_s2] ss:$0 sm:$0xff] }
  0x3e   :  { %376 = vmatpush.msrb.mxu1 %v504_v25  ;;  %339 = vmatpush.msrb.mxu0 %v166_v32 }
  0x40   :  { %378 = vmatpush.msrb.mxu1 %v508_v28  ;;  %343 = vmatpush.msrb.mxu0 %v172_v37 }
  0x42   :  { %380 = vmatpush.msrb.mxu1 %v527_v35  ;;  %347 = vmatpush.msrb.mxu0 %v178_v48 }
  0x44   :  { %382 = vmatpush.msrb.mxu1 %v544_v45  ;;  %351 = vmatpush.msrb.mxu0 %v184_v56 }
  0x46   :  { %384 = vmatpush.msrb.mxu1 %v556_v51  ;;  %355 = vmatpush.msrb.mxu0 %v190_v1 }
  0x47   :  { %357 = vmatmul.f32.vlgmr.msrb.gmra.mxu0 %v600_v18 }
  0x48   :  { %386 = vmatpush.msrb.mxu1 %v564_v54 }
  0x4a   :  { %388 = vmatpush.msrb.mxu1 %v580_v63 }
  0x4c   :  { %390 = vmatpush.msrb.mxu1 %v598_v13 }
  0x4e   :  { %392 = vmatpush.msrb.mxu1 %v602_v26 }
  0x4f   :  { %394 = vmatmul.f32.vlgmr.msrb.gmra.mxu1 %v600_v18 }
  0xa8   :  { %v95_v4 = vpop.f32.mrf.mxu0 }
  0xac   :  { %v196_v3 = vpop.f32.mrf.mxu1  ;;  %v289_v11 = vpop.f32.mrf.mxu3 }
  0xad   :  { %v197_v5 = vadd.f32 %v196_v3, %v95_v4 }
  0xae   :  { %v250_v9 = vpop.f32.mrf.mxu2 }
  0xaf   :  { %v251_v10 = vadd.f32 %v250_v9, %v197_v5 }
  0xb1   :  { %v290_v14 = vadd.f32 %v289_v11, %v251_v10 }
  0xc4   :  { %v358_v15 = vpop.f32.mrf.mxu0 }
  0xc5   :  { %v359_v16 = vadd.f32 %v358_v15, %v290_v14 }
  0xcc   :  { %v395_v19 = vpop.f32.mrf.mxu1 }
  0xcd   :  { %v396_v20 = vadd.f32 %v395_v19, %v359_v16 }
  0xcf   :  { %v398_v21 = vadd.f32 %v413_v17, %v396_v20 }
  0xd1   :  { %404 = vst [vmem:[%s716_s3] sm:$0xff] %v398_v21 }
  0xd2   :  { %409 = vsyncpa [#allocation4], 1 }

</bundles_post_ra>
